<compile_context>
chip_gen: v5e
topology: v5e:2x2
jax: 0.10.0
libtpu: 0.0.40
codegen_flags: <defaults>
</compile_context>

<pallas_src>
import functools

import jax
import jax.numpy as jnp
from jax import lax
from jax.experimental import pallas as pl
from jax.experimental.pallas import tpu as pltpu


_SLAB_BUDGET = 24 * 1024 * 1024   # double-buffered resident (TB, V) f32 slab
_WTILE_BUDGET = 8 * 1024 * 1024   # double-buffered streamed weight tile


def _vmem_limit():
    """Per-generation scoped-VMEM limit (~3/4 of physical: v5e/v6e 128 MiB,
    v7x 64 MiB), conservative fallback if the query is unavailable."""
    try:
        cap = pltpu.get_tpu_info().vmem_capacity_bytes
    except Exception:  # pragma: no cover
        cap = 64 * 1024 * 1024
    return int(min(cap * 3 // 4, 96 * 1024 * 1024))


def _pick_lane_tile(n, other_dim, elem_bytes=2, budget=_WTILE_BUDGET):
    """Largest lane-dense (multiple of 128) tile of n whose double-buffered
    (tile x other_dim) stream fits the budget; falls back to full n."""
    for t in (4096, 2048, 1024, 512, 256, 128):
        if n % t == 0 and 2 * t * other_dim * elem_bytes <= budget:
            return t
    return n


def _pick_row_block(b, v):
    """Batch tile: divides b, multiple of 16 (bf16-safe), keeps the
    double-buffered (TB, V) f32 output slab under budget, and (if possible)
    gives >= 2 batch tiles so the v7x megacore 'parallel' axis has work."""
    cap = max(16, _SLAB_BUDGET // (2 * v * 4))
    divs = [t for t in (256, 128, 64, 32, 16) if b % t == 0 and t <= cap]
    if not divs:
        return b                       # tiny/odd batch: one full-extent tile
    for t in divs:                     # largest first
        if b // t >= 2:
            return t
    return divs[0]


# ---------------------------------------------------------------------------
# Shared epilogue: normalize the VMEM-resident (TB, V) logits slab in place.
# ---------------------------------------------------------------------------
def _normalize_slab(y_ref, m, inv_l, tv, nv):
    def body(c, carry):
        col = pl.multiple_of(c * tv, tv)
        y_ref[:, pl.ds(col, tv)] = jnp.exp(y_ref[:, pl.ds(col, tv)] - m) * inv_l
        return carry

    lax.fori_loop(0, nv, body, 0)


# ---------------------------------------------------------------------------
# Kernel 1 (dense, semantics-preserving): h = x @ W_I_rows, tiled over V.
#   x: (TB, TK) bf16, w_i_rows: (TK, D) bf16  -> h: (TB, D) bf16 (f32 acc).
# ---------------------------------------------------------------------------
def _hidden_kernel(x_ref, wi_ref, h_ref, acc_ref):
    k = pl.program_id(1)

    @pl.when(k == 0)
    def _():
        acc_ref[...] = jnp.zeros_like(acc_ref)

    acc_ref[...] += jnp.dot(x_ref[...], wi_ref[...],
                            preferred_element_type=jnp.float32)

    @pl.when(k == pl.num_programs(1) - 1)
    def _():
        h_ref[...] = acc_ref[...].astype(h_ref.dtype)


def _hidden_dense(x_bf16, w_i_rows_bf16, tb, tk):
    B, V = x_bf16.shape
    D = w_i_rows_bf16.shape[1]
    return pl.pallas_call(
        _hidden_kernel,
        out_shape=jax.ShapeDtypeStruct((B, D), jnp.bfloat16),
        grid=(B // tb, V // tk),
        in_specs=[
            pl.BlockSpec((tb, tk), lambda i, k: (i, k)),
            pl.BlockSpec((tk, D), lambda i, k: (k, 0)),
        ],
        out_specs=pl.BlockSpec((tb, D), lambda i, k: (i, 0)),
        scratch_shapes=[pltpu.VMEM((tb, D), jnp.float32)],
        compiler_params=pltpu.CompilerParams(
            dimension_semantics=("parallel", "arbitrary"),
            vmem_limit_bytes=_vmem_limit(),
        ),
    )(x_bf16, w_i_rows_bf16)


# ---------------------------------------------------------------------------
# Kernel 2 (fused head): logits streamed over V tiles into the VMEM-resident
# output slab + online softmax stats; normalization fused into the epilogue.
# ---------------------------------------------------------------------------
def _fused_head_kernel(h_ref, wot_ref, y_ref, m_acc, l_acc, *, tv, nv):
    j = pl.program_id(1)

    @pl.when(j == 0)
    def _():
        m_acc[...] = jnp.full_like(m_acc, -jnp.inf)
        l_acc[...] = jnp.zeros_like(l_acc)

    # (TB, D) x (D, TV) -> (TB, TV); bf16 MXU, f32 accumulation.
    logits = jnp.dot(h_ref[...], wot_ref[...],
                     preferred_element_type=jnp.float32)
    col = pl.multiple_of(j * tv, tv)
    y_ref[:, pl.ds(col, tv)] = logits          # stash into resident slab

    m_prev = m_acc[...]
    m_new = jnp.maximum(m_prev, jnp.max(logits, axis=-1, keepdims=True))
    l_acc[...] = l_acc[...] * jnp.exp(m_prev - m_new) + jnp.sum(
        jnp.exp(logits - m_new), axis=-1, keepdims=True)
    m_acc[...] = m_new

    @pl.when(j == nv - 1)
    def _():
        # Exact normalization (1/l) so row sums hit f32 precision.
        _normalize_slab(y_ref, m_acc[...], 1.0 / l_acc[...], tv, nv)


def _fused_head(h_bf16, w_o_t_bf16, tb):
    B, D = h_bf16.shape
    V = w_o_t_bf16.shape[1]
    tv = _pick_lane_tile(V, D)
    nv = V // tv
    return pl.pallas_call(
        functools.partial(_fused_head_kernel, tv=tv, nv=nv),
        out_shape=jax.ShapeDtypeStruct((B, V), jnp.float32),
        grid=(B // tb, nv),
        in_specs=[
            pl.BlockSpec((tb, D), lambda i, j: (i, 0)),
            pl.BlockSpec((D, tv), lambda i, j: (0, j)),
        ],
        # Output block is the full (TB, V) slab, resident across the j axis.
        out_specs=pl.BlockSpec((tb, V), lambda i, j: (i, 0)),
        scratch_shapes=[pltpu.VMEM((tb, 1), jnp.float32),
                        pltpu.VMEM((tb, 1), jnp.float32)],
        compiler_params=pltpu.CompilerParams(
            dimension_semantics=("parallel", "arbitrary"),
            vmem_limit_bytes=_vmem_limit(),
        ),
    )(h_bf16, w_o_t_bf16)


# ---------------------------------------------------------------------------
# Kernel 3 (one-hot fast path, fully fused): embedding gather (prologue) +
# streamed logits + online softmax + fused normalization.  No h intermediate.
# ---------------------------------------------------------------------------
def _fused_onehot_head_kernel(ids_ref, wi_hbm, wot_ref, y_ref,
                              h_buf, sems, m_acc, l_acc, *, tb, tv, nv, v):
    i = pl.program_id(0)
    j = pl.program_id(1)

    @pl.when(j == 0)
    def _():
        # Embedding gather: DMA tb rows of W_I straight into VMEM scratch.
        # ids SMEM reads hoisted above the first wait; ids clamped to [0, v)
        # so a bad id cannot become an OOB HBM DMA; descriptors built once.
        rows = [jnp.clip(ids_ref[i * tb + t], 0, v - 1) for t in range(tb)]
        copies = [
            pltpu.make_async_copy(wi_hbm.at[pl.ds(rows[t], 1)],
                                  h_buf.at[pl.ds(t, 1)],
                                  sems.at[t])
            for t in range(tb)
        ]
        for c in copies:
            c.start()
        for c in copies:
            c.wait()
        m_acc[...] = jnp.full_like(m_acc, -jnp.inf)
        l_acc[...] = jnp.zeros_like(l_acc)

    logits = jnp.dot(h_buf[...], wot_ref[...],
                     preferred_element_type=jnp.float32)
    col = pl.multiple_of(j * tv, tv)
    y_ref[:, pl.ds(col, tv)] = logits

    m_prev = m_acc[...]
    m_new = jnp.maximum(m_prev, jnp.max(logits, axis=-1, keepdims=True))
    l_acc[...] = l_acc[...] * jnp.exp(m_prev - m_new) + jnp.sum(
        jnp.exp(logits - m_new), axis=-1, keepdims=True)
    m_acc[...] = m_new

    @pl.when(j == nv - 1)
    def _():
        _normalize_slab(y_ref, m_acc[...], 1.0 / l_acc[...], tv, nv)


# ---------------------------------------------------------------------------
# Public wrappers.
# ---------------------------------------------------------------------------
def prepare_weights(w_i, w_o):
    """One-time (outside the hot path) layout + dtype prep of torch-layout
    weights W_I: (d, v), W_O: (v, d):
        w_i_rows: (v, d) bf16  -- embedding rows / standard LHS contraction
        w_o_t   : (d, v) bf16  -- pre-transposed RHS, no per-tile transposes
    NOTE: bf16 weights deviate from the strict f32 PyTorch forward; the
    matmuls still accumulate in f32 and softmax math is f32."""
    return jnp.asarray(w_i, jnp.bfloat16).T, jnp.asarray(w_o, jnp.bfloat16).T


@jax.jit
def mikolov_bi_sg_forward(x, w_i_rows, w_o_t):
    """Semantics-preserving dense forward: softmax((x @ W_I^T) @ W_O^T, dim=1).
    x: (B, V); w_i_rows: (v, d); w_o_t: (d, v) (ideally pre-cast bf16)."""
    B, V = x.shape
    Vw, D = w_i_rows.shape
    assert Vw == V and w_o_t.shape == (D, V)
    # x cast to bf16 once (one-hot / count inputs are exact in bf16); the
    # output stays explicitly float32.
    x_bf = x.astype(jnp.bfloat16)
    tb = _pick_row_block(B, V)
    tk = _pick_lane_tile(V, tb + D)
    h = _hidden_dense(x_bf, w_i_rows.astype(jnp.bfloat16), tb, tk)
    return _fused_head(h, w_o_t.astype(jnp.bfloat16), tb)


@jax.jit
def mikolov_bi_sg_forward_onehot(ids, w_i_rows, w_o_t):
    """Word2vec fast path: x is one-hot, so W_I(x) is a row gather of W_I,
    fused into the softmax head (single kernel, no h intermediate)."""
    (B,) = ids.shape
    V, D = w_i_rows.shape
    assert w_o_t.shape == (D, V)
    w_i_bf = w_i_rows.astype(jnp.bfloat16)
    w_o_bf = w_o_t.astype(jnp.bfloat16)
    tb = _pick_row_block(B, V)
    tv = _pick_lane_tile(V, D)
    nv = V // tv

    grid_spec = pltpu.PrefetchScalarGridSpec(
        num_scalar_prefetch=1,
        grid=(B // tb, nv),
        in_specs=[
            pl.BlockSpec(memory_space=pl.ANY),                 # W_I rows, HBM
            pl.BlockSpec((D, tv), lambda i, j, ids: (0, j)),   # W_O^T stream
        ],
        out_specs=pl.BlockSpec((tb, V), lambda i, j, ids: (i, 0)),
        scratch_shapes=[
            pltpu.VMEM((tb, D), jnp.bfloat16),     # gathered h rows
            pltpu.SemaphoreType.DMA((tb,)),
            pltpu.VMEM((tb, 1), jnp.float32),      # running max
            pltpu.VMEM((tb, 1), jnp.float32),      # running sum
        ],
    )
    return pl.pallas_call(
        functools.partial(_fused_onehot_head_kernel, tb=tb, tv=tv, nv=nv, v=V),
        out_shape=jax.ShapeDtypeStruct((B, V), jnp.float32),
        grid_spec=grid_spec,
        compiler_params=pltpu.CompilerParams(
            dimension_semantics=("parallel", "arbitrary"),
            vmem_limit_bytes=_vmem_limit(),
        ),
    )(jnp.asarray(ids, jnp.int32), w_i_bf, w_o_bf)


if __name__ == "__main__":
    # params: v = vocab size, d = embedding dim (small but multi-vreg).
    B, V, D = 8, 1024, 128

    key = jax.random.PRNGKey(0)
    k_ids, k_wi, k_wo = jax.random.split(key, 3)

    # torch nn.Linear-style uniform init, torch layouts.
    w_i = jax.random.uniform(k_wi, (D, V), jnp.float32,
                             minval=-1.0 / (V ** 0.5), maxval=1.0 / (V ** 0.5))
    w_o = jax.random.uniform(k_wo, (V, D), jnp.float32,
                             minval=-1.0 / (D ** 0.5), maxval=1.0 / (D ** 0.5))

    ids = jax.random.randint(k_ids, (B,), 0, V, dtype=jnp.int32)
    x = jax.nn.one_hot(ids, V, dtype=jnp.float32)

    # Kernel-layout weights prepared ONCE, outside the hot path.
    w_i_rows, w_o_t = prepare_weights(w_i, w_o)

    y = jax.block_until_ready(mikolov_bi_sg_forward(x, w_i_rows, w_o_t))
    y_fast = jax.block_until_ready(
        mikolov_bi_sg_forward_onehot(ids, w_i_rows, w_o_t))

    # Reference with the same bf16-quantized weights, f32 math.
    w_i_q = w_i_rows.astype(jnp.float32)          # (V, D)
    w_o_q = w_o_t.astype(jnp.float32)             # (D, V)
    y_ref = jax.nn.softmax((x @ w_i_q) @ w_o_q, axis=1)

    assert y.shape == (B, V) and y.dtype == jnp.float32
    assert y_fast.shape == (B, V) and y_fast.dtype == jnp.float32
    assert jnp.allclose(y, y_ref, atol=1e-4)
    assert jnp.allclose(y_fast, y_ref, atol=1e-4)
    assert jnp.allclose(y_fast, y, atol=1e-5)
    # Exact (non-approx) normalization: row sums are 1 to f32 precision.
    assert jnp.allclose(jnp.sum(y, axis=1), jnp.ones((B,)), atol=1e-5)
    assert jnp.allclose(jnp.sum(y_fast, axis=1), jnp.ones((B,)), atol=1e-5)

    print("KERNEL_OK")
</pallas_src>

<mosaic_0001>
module attributes {stable_mosaic.version = 11 : i64} {
  func.func @_hidden_kernel(%arg0: i32, %arg1: i32, %arg2: memref<8x1024xbf16, #tpu.memory_space<vmem>>, %arg3: memref<1024x128xbf16, #tpu.memory_space<vmem>>, %arg4: memref<8x128xbf16, #tpu.memory_space<vmem>>, %arg5: memref<8x128xf32, #tpu.memory_space<vmem>>) attributes {dimension_semantics = [#tpu.dimension_semantics<parallel>, #tpu.dimension_semantics<arbitrary>], iteration_bounds = array<i64: 1, 1>, scalar_prefetch = 0 : i64, scratch_operands = 1 : i64, tpu.core_type = #tpu.core_type<tc>, window_params = [{transform_indices = @transform_0, window_bounds = array<i64: 8, 1024>}, {transform_indices = @transform_1, window_bounds = array<i64: 1024, 128>}, {transform_indices = @transform_2, window_bounds = array<i64: 8, 128>}]} {
    %c0_i32 = arith.constant 0 : i32
    %0 = arith.cmpi eq, %arg1, %c0_i32 : i32
    %1 = arith.extui %0 : i1 to i32
    %c0_i32_0 = arith.constant 0 : i32
    %2 = arith.cmpi ne, %1, %c0_i32_0 : i32
    scf.if %2 {
      %cst_10 = arith.constant 0.000000e+00 : f32
      %12 = vector.broadcast %cst_10 : f32 to vector<8x128xf32>
      %c0_11 = arith.constant 0 : index
      %c0_12 = arith.constant 0 : index
      %13 = vector.load %arg5[%c0_11, %c0_12] : memref<8x128xf32, #tpu.memory_space<vmem>>, vector<8x128xf32>
      tpu.vector_store %arg5[%c0_11, %c0_12], %12 {strides = array<i32>} : memref<8x128xf32, #tpu.memory_space<vmem>>, vector<8x128xf32>,
    } else {
    }
    %c0 = arith.constant 0 : index
    %c0_1 = arith.constant 0 : index
    %3 = vector.load %arg5[%c0, %c0_1] : memref<8x128xf32, #tpu.memory_space<vmem>>, vector<8x128xf32>
    %c0_2 = arith.constant 0 : index
    %c0_3 = arith.constant 0 : index
    %4 = vector.load %arg2[%c0_2, %c0_3] : memref<8x1024xbf16, #tpu.memory_space<vmem>>, vector<8x1024xbf16>
    %c0_4 = arith.constant 0 : index
    %c0_5 = arith.constant 0 : index
    %5 = vector.load %arg3[%c0_4, %c0_5] : memref<1024x128xbf16, #tpu.memory_space<vmem>>, vector<1024x128xbf16>
    %cst = arith.constant dense<0.000000e+00> : vector<8x128xf32>
    %6 = tpu.matmul %4, %5, %cst {dimension_numbers = #tpu.dot_dimension_numbers<[1], [0], [0], [1], [0, 0, 1, 1], [], []>} : vector<8x1024xbf16>, vector<1024x128xbf16>, vector<8x128xf32> -> vector<8x128xf32>
    %7 = arith.addf %3, %6 : vector<8x128xf32>
    %c0_6 = arith.constant 0 : index
    %c0_7 = arith.constant 0 : index
    %8 = vector.load %arg5[%c0_6, %c0_7] : memref<8x128xf32, #tpu.memory_space<vmem>>, vector<8x128xf32>
    tpu.vector_store %arg5[%c0_6, %c0_7], %7 {strides = array<i32>} : memref<8x128xf32, #tpu.memory_space<vmem>>, vector<8x128xf32>,
    %c0_i32_8 = arith.constant 0 : i32
    %9 = arith.cmpi eq, %arg1, %c0_i32_8 : i32
    %10 = arith.extui %9 : i1 to i32
    %c0_i32_9 = arith.constant 0 : i32
    %11 = arith.cmpi ne, %10, %c0_i32_9 : i32
    scf.if %11 {
      %c0_10 = arith.constant 0 : index
      %c0_11 = arith.constant 0 : index
      %12 = vector.load %arg5[%c0_10, %c0_11] : memref<8x128xf32, #tpu.memory_space<vmem>>, vector<8x128xf32>
      %13 = arith.truncf %12 : vector<8x128xf32> to vector<8x128xbf16>
      %c0_12 = arith.constant 0 : index
      %c0_13 = arith.constant 0 : index
      %14 = vector.load %arg4[%c0_12, %c0_13] : memref<8x128xbf16, #tpu.memory_space<vmem>>, vector<8x128xbf16>
      tpu.vector_store %arg4[%c0_12, %c0_13], %13 {strides = array<i32>} : memref<8x128xbf16, #tpu.memory_space<vmem>>, vector<8x128xbf16>,
    } else {
    }
    return
  }
  func.func @transform_0(%arg0: i32, %arg1: i32) -> (i32, i32) {
    %c0_i32 = arith.constant 0 : i32
    return %arg0, %arg1 : i32, i32
  }
  func.func @transform_1(%arg0: i32, %arg1: i32) -> (i32, i32) {
    %c0_i32 = arith.constant 0 : i32
    %c0_i32_0 = arith.constant 0 : i32
    return %arg1, %c0_i32 : i32, i32
  }
  func.func @transform_2(%arg0: i32, %arg1: i32) -> (i32, i32) {
    %c0_i32 = arith.constant 0 : i32
    %c0_i32_0 = arith.constant 0 : i32
    return %arg0, %c0_i32 : i32, i32
  }
}

module attributes {stable_mosaic.version = 11 : i64} {
  func.func @_fused_head_kernel(%arg0: i32, %arg1: i32, %arg2: memref<8x128xbf16, #tpu.memory_space<vmem>>, %arg3: memref<128x1024xbf16, #tpu.memory_space<vmem>>, %arg4: memref<8x1024xf32, #tpu.memory_space<vmem>>, %arg5: memref<8x1xf32, #tpu.memory_space<vmem>>, %arg6: memref<8x1xf32, #tpu.memory_space<vmem>>) attributes {dimension_semantics = [#tpu.dimension_semantics<parallel>, #tpu.dimension_semantics<arbitrary>], iteration_bounds = array<i64: 1, 1>, scalar_prefetch = 0 : i64, scratch_operands = 2 : i64, tpu.core_type = #tpu.core_type<tc>, window_params = [{transform_indices = @transform_0, window_bounds = array<i64: 8, 128>}, {transform_indices = @transform_1, window_bounds = array<i64: 128, 1024>}, {transform_indices = @transform_2, window_bounds = array<i64: 8, 1024>}]} {
    %c0_i32 = arith.constant 0 : i32
    %0 = arith.cmpi eq, %arg1, %c0_i32 : i32
    %1 = arith.extui %0 : i1 to i32
    %c0_i32_0 = arith.constant 0 : i32
    %2 = arith.cmpi ne, %1, %c0_i32_0 : i32
    scf.if %2 {
      %cst_17 = arith.constant 0xFF800000 : f32
      %29 = vector.broadcast %cst_17 : f32 to vector<8x1xf32>
      %c0_18 = arith.constant 0 : index
      %c0_19 = arith.constant 0 : index
      %30 = vector.load %arg5[%c0_18, %c0_19] : memref<8x1xf32, #tpu.memory_space<vmem>>, vector<8x1xf32>
      tpu.vector_store %arg5[%c0_18, %c0_19], %29 {strides = array<i32>} : memref<8x1xf32, #tpu.memory_space<vmem>>, vector<8x1xf32>,
      %cst_20 = arith.constant 0.000000e+00 : f32
      %31 = vector.broadcast %cst_20 : f32 to vector<8x1xf32>
      %c0_21 = arith.constant 0 : index
      %c0_22 = arith.constant 0 : index
      %32 = vector.load %arg6[%c0_21, %c0_22] : memref<8x1xf32, #tpu.memory_space<vmem>>, vector<8x1xf32>
      tpu.vector_store %arg6[%c0_21, %c0_22], %31 {strides = array<i32>} : memref<8x1xf32, #tpu.memory_space<vmem>>, vector<8x1xf32>,
    } else {
    }
    %c0 = arith.constant 0 : index
    %c0_1 = arith.constant 0 : index
    %3 = vector.load %arg2[%c0, %c0_1] : memref<8x128xbf16, #tpu.memory_space<vmem>>, vector<8x128xbf16>
    %c0_2 = arith.constant 0 : index
    %c0_3 = arith.constant 0 : index
    %4 = vector.load %arg3[%c0_2, %c0_3] : memref<128x1024xbf16, #tpu.memory_space<vmem>>, vector<128x1024xbf16>
    %cst = arith.constant dense<0.000000e+00> : vector<8x1024xf32>
    %5 = tpu.matmul %3, %4, %cst {dimension_numbers = #tpu.dot_dimension_numbers<[1], [0], [0], [1], [0, 0, 1, 1], [], []>} : vector<8x128xbf16>, vector<128x1024xbf16>, vector<8x1024xf32> -> vector<8x1024xf32>
    %c1024_i32 = arith.constant 1024 : i32
    %6 = arith.muli %arg1, %c1024_i32 : i32
    %7 = tpu.assume_multiple %6, 1024 : i32
    %c0_4 = arith.constant 0 : index
    %8 = arith.index_cast %7 : i32 to index
    %9 = vector.load %arg4[%c0_4, %8] : memref<8x1024xf32, #tpu.memory_space<vmem>>, vector<8x1024xf32>
    tpu.vector_store %arg4[%c0_4, %8], %5 {strides = array<i32>} : memref<8x1024xf32, #tpu.memory_space<vmem>>, vector<8x1024xf32>,
    %c0_5 = arith.constant 0 : index
    %c0_6 = arith.constant 0 : index
    %10 = vector.load %arg5[%c0_5, %c0_6] : memref<8x1xf32, #tpu.memory_space<vmem>>, vector<8x1xf32>
    %cst_7 = arith.constant dense<0xFF800000> : vector<8xf32>
    %11 = vector.multi_reduction <maximumf>, %5, %cst_7 [1] : vector<8x1024xf32> to vector<8xf32>
    %12 = vector.shape_cast %11 : vector<8xf32> to vector<8x1xf32>
    %13 = arith.maximumf %10, %12 : vector<8x1xf32>
    %c0_8 = arith.constant 0 : index
    %c0_9 = arith.constant 0 : index
    %14 = vector.load %arg6[%c0_8, %c0_9] : memref<8x1xf32, #tpu.memory_space<vmem>>, vector<8x1xf32>
    %15 = arith.subf %10, %13 : vector<8x1xf32>
    %16 = math.exp %15 : vector<8x1xf32>
    %17 = arith.mulf %14, %16 : vector<8x1xf32>
    %18 = vector.broadcast %13 : vector<8x1xf32> to vector<8x1024xf32>
    %19 = arith.subf %5, %18 : vector<8x1024xf32>
    %20 = math.exp %19 : vector<8x1024xf32>
    %cst_10 = arith.constant dense<0.000000e+00> : vector<8xf32>
    %21 = vector.multi_reduction <add>, %20, %cst_10 [1] : vector<8x1024xf32> to vector<8xf32>
    %22 = vector.shape_cast %21 : vector<8xf32> to vector<8x1xf32>
    %23 = arith.addf %17, %22 : vector<8x1xf32>
    %c0_11 = arith.constant 0 : index
    %c0_12 = arith.constant 0 : index
    %24 = vector.load %arg6[%c0_11, %c0_12] : memref<8x1xf32, #tpu.memory_space<vmem>>, vector<8x1xf32>
    tpu.vector_store %arg6[%c0_11, %c0_12], %23 {strides = array<i32>} : memref<8x1xf32, #tpu.memory_space<vmem>>, vector<8x1xf32>,
    %c0_13 = arith.constant 0 : index
    %c0_14 = arith.constant 0 : index
    %25 = vector.load %arg5[%c0_13, %c0_14] : memref<8x1xf32, #tpu.memory_space<vmem>>, vector<8x1xf32>
    tpu.vector_store %arg5[%c0_13, %c0_14], %13 {strides = array<i32>} : memref<8x1xf32, #tpu.memory_space<vmem>>, vector<8x1xf32>,
    %c0_i32_15 = arith.constant 0 : i32
    %26 = arith.cmpi eq, %arg1, %c0_i32_15 : i32
    %27 = arith.extui %26 : i1 to i32
    %c0_i32_16 = arith.constant 0 : i32
    %28 = arith.cmpi ne, %27, %c0_i32_16 : i32
    scf.if %28 {
      %c0_17 = arith.constant 0 : index
      %c0_18 = arith.constant 0 : index
      %29 = vector.load %arg5[%c0_17, %c0_18] : memref<8x1xf32, #tpu.memory_space<vmem>>, vector<8x1xf32>
      %c0_19 = arith.constant 0 : index
      %c0_20 = arith.constant 0 : index
      %30 = vector.load %arg6[%c0_19, %c0_20] : memref<8x1xf32, #tpu.memory_space<vmem>>, vector<8x1xf32>
      %cst_21 = arith.constant 1.000000e+00 : f32
      %31 = vector.broadcast %cst_21 : f32 to vector<8x1xf32>
      %32 = arith.divf %31, %30 : vector<8x1xf32>
      %c0_i32_22 = arith.constant 0 : i32
      %c1024_i32_23 = arith.constant 1024 : i32
      %33 = arith.muli %c0_i32_22, %c1024_i32_23 : i32
      %34 = tpu.assume_multiple %33, 1024 : i32
      %c0_24 = arith.constant 0 : index
      %35 = arith.index_cast %34 : i32 to index
      %36 = vector.load %arg4[%c0_24, %35] : memref<8x1024xf32, #tpu.memory_space<vmem>>, vector<8x1024xf32>
      %37 = vector.broadcast %29 : vector<8x1xf32> to vector<8x1024xf32>
      %38 = arith.subf %36, %37 : vector<8x1024xf32>
      %39 = math.exp %38 : vector<8x1024xf32>
      %40 = vector.broadcast %32 : vector<8x1xf32> to vector<8x1024xf32>
      %41 = arith.mulf %39, %40 : vector<8x1024xf32>
      %c0_25 = arith.constant 0 : index
      %42 = arith.index_cast %34 : i32 to index
      %43 = vector.load %arg4[%c0_25, %42] : memref<8x1024xf32, #tpu.memory_space<vmem>>, vector<8x1024xf32>
      tpu.vector_store %arg4[%c0_25, %42], %41 {strides = array<i32>} : memref<8x1024xf32, #tpu.memory_space<vmem>>, vector<8x1024xf32>,
      %c1_i32 = arith.constant 1 : i32
    } else {
    }
    return
  }
  func.func @transform_0(%arg0: i32, %arg1: i32) -> (i32, i32) {
    %c0_i32 = arith.constant 0 : i32
    %c0_i32_0 = arith.constant 0 : i32
    return %arg0, %c0_i32 : i32, i32
  }
  func.func @transform_1(%arg0: i32, %arg1: i32) -> (i32, i32) {
    %c0_i32 = arith.constant 0 : i32
    %c0_i32_0 = arith.constant 0 : i32
    return %c0_i32, %arg1 : i32, i32
  }
  func.func @transform_2(%arg0: i32, %arg1: i32) -> (i32, i32) {
    %c0_i32 = arith.constant 0 : i32
    %c0_i32_0 = arith.constant 0 : i32
    return %arg0, %c0_i32 : i32, i32
  }
}

</mosaic_0001>

<bundles_post_ra>
// kernel: mikolov_bi_sg_forward.3
= control target key start
LH: loop header
LB: loop body
LE: loop exit
PB: predicated region body
PF: predicated region fallthrough
CT: control target
= control target key end

     0   :  { %7 = vsyncpa [#allocation5], 0  ;;  %s1195_s0 = inlined_call_operand.vmem [shape: bf16[8,128], index: 0, kind: input, shape index: {}]   ;;  %s1196_s1 = inlined_call_operand.hbm [shape: bf16[128,1024], index: 1, kind: input, shape index: {}]   ;;  %s1197_s2 = inlined_call_operand.hbm [shape: f32[8,1024], index: 2, kind: output, shape index: {}]  }
   0x1   :  { %8 = vsyncpa [#allocation6], 0  ;;  %s15_s11 = sshll.u32 %s1196_s1, 4  ;;  %s1110_s12 = smov [#allocation4]   ;;  %s16_s11 = int_to_ptr.hbm [resolvable:$true] %s15_s11 }
   0x2   :  { %s17_s13 = sshll.u32 %s1110_s12, 4  ;;  %s1111_s14 = smov 512   ;;  %s18_s13 = int_to_ptr.vmem [resolvable:$true] %s17_s13 }
   0x3   :  { %s1112_s15 = smov 32  }
   0x4   :  { %23 = dma.hbm_to_vmem [thread:$0]  %s16_s11, 8192, %s18_s13, [#allocation5], %s1111_s14, %s1111_s14, %s1112_s15  }
   0x5   :  { %1106 = dma.done.wait [#allocation5], 8192  }
   0x6   :  { %1107 = vsyncadd [#allocation5], 4294959104  ;;  %v918_v0 = vld [vmem:[#allocation4 + $0x1c0] sm:$0xf]  ;;  %v1004_v2 = vld [vmem:[#allocation4 + $0x1c4] sm:$0xf] }
   0x7   :  { %v1008_v1 = vld [vmem:[#allocation4 + $0x1dc] sm:$0xf0]  ;;  %v920_v4 = vld [vmem:[#allocation4 + $0x1e0] sm:$0xf0]  ;;  %v926_v5 = vld [vmem:[#allocation4 + $0x1c8] sm:$0xf] }
   0x8   :  { %v919_v3 = vor.u32 %v1008_v1, %v918_v0  ;;  %v1009_v6 = vld [vmem:[#allocation4 + $0x1e4] sm:$0xf0]  ;;  %v923_v7 = vor.u32 %v1004_v2, %v920_v4  ;;  %v1005_v9 = vld [vmem:[#allocation4 + $0x1cc] sm:$0xf]  ;;  %v886_v11 = vld [vmem:[#allocation4 + $0x180] sm:$0xf] }
   0x9   :  { %v927_v8 = vor.u32 %v1009_v6, %v926_v5  ;;  %v928_v10 = vld [vmem:[#allocation4 + $0x1e8] sm:$0xf0]  ;;  %v1000_v13 = vld [vmem:[#allocation4 + $0x19c] sm:$0xf0]  ;;  %v996_v14 = vld [vmem:[#allocation4 + $0x184] sm:$0xf] }
   0xa   :  { %420 = vmatpush.bf16.msra.mxu0 %v919_v3  ;;  %v931_v12 = vor.u32 %v1005_v9, %v928_v10  ;;  %v888_v15 = vld [vmem:[#allocation4 + $0x1a0] sm:$0xf0]  ;;  %433 = vmatpush.bf16.msra.mxu1 %v923_v7  ;;  %v887_v16 = vor.u32 %v1000_v13, %v886_v11  ;;  %v894_v18 = vld [vmem:[#allocation4 + $0x188] sm:$0xf]  ;;  %v997_v20 = vld [vmem:[#allocation4 + $0x18c] sm:$0xf] }
   0xb   :  { %446 = vmatpush.bf16.msra.mxu2 %v927_v8  ;;  %v891_v17 = vor.u32 %v996_v14, %v888_v15  ;;  %v1001_v19 = vld [vmem:[#allocation4 + $0x1a4] sm:$0xf0]  ;;  %v896_v22 = vld [vmem:[#allocation4 + $0x1a8] sm:$0xf0]  ;;  %v854_v23 = vld [vmem:[#allocation4 + $0x140] sm:$0xf] }
   0xc   :  { %459 = vmatpush.bf16.msra.mxu3 %v931_v12  ;;  %v895_v21 = vor.u32 %v1001_v19, %v894_v18  ;;  %v992_v24 = vld [vmem:[#allocation4 + $0x15c] sm:$0xf0]  ;;  %v899_v25 = vor.u32 %v997_v20, %v896_v22  ;;  %v988_v26 = vld [vmem:[#allocation4 + $0x144] sm:$0xf]  ;;  %v862_v28 = vld [vmem:[#allocation4 + $0x148] sm:$0xf] }
   0xd   :  { %v856_v27 = vld [vmem:[#allocation4 + $0x160] sm:$0xf0]  ;;  %v855_v29 = vor.u32 %v992_v24, %v854_v23  ;;  %v993_v30 = vld [vmem:[#allocation4 + $0x164] sm:$0xf0]  ;;  %v989_v31 = vld [vmem:[#allocation4 + $0x14c] sm:$0xf] }
   0xe   :  { %421 = vmatpush.bf16.msra.mxu0 %v887_v16  ;;  %v864_v32 = vld [vmem:[#allocation4 + $0x168] sm:$0xf0]  ;;  %434 = vmatpush.bf16.msra.mxu1 %v891_v17  ;;  %v859_v33 = vor.u32 %v988_v26, %v856_v27  ;;  %v863_v34 = vor.u32 %v993_v30, %v862_v28  ;;  %v822_v35 = vld [vmem:[#allocation4 + $0x100] sm:$0xf]  ;;  %v980_v37 = vld [vmem:[#allocation4 + $0x104] sm:$0xf] }
   0xf   :  { %447 = vmatpush.bf16.msra.mxu2 %v895_v21  ;;  %v984_v36 = vld [vmem:[#allocation4 + $0x11c] sm:$0xf0]  ;;  %v867_v38 = vor.u32 %v989_v31, %v864_v32  ;;  %v824_v39 = vld [vmem:[#allocation4 + $0x120] sm:$0xf0]  ;;  %v830_v40 = vld [vmem:[#allocation4 + $0x108] sm:$0xf] }
  0x10   :  { %460 = vmatpush.bf16.msra.mxu3 %v899_v25  ;;  %v985_v41 = vld [vmem:[#allocation4 + $0x124] sm:$0xf0]  ;;  %v981_v42 = vld [vmem:[#allocation4 + $0x10c] sm:$0xf]  ;;  %v823_v44 = vor.u32 %v984_v36, %v822_v35  ;;  %v827_v45 = vor.u32 %v980_v37, %v824_v39  ;;  %v790_v47 = vld [vmem:[#allocation4 + $0xc0] sm:$0xf] }
  0x11   :  { %v832_v43 = vld [vmem:[#allocation4 + $0x128] sm:$0xf0]  ;;  %v831_v46 = vor.u32 %v985_v41, %v830_v40  ;;  %v976_v48 = vld [vmem:[#allocation4 + $0xdc] sm:$0xf0]  ;;  %v972_v49 = vld [vmem:[#allocation4 + $0xc4] sm:$0xf] }
  0x12   :  { %422 = vmatpush.bf16.msra.mxu0 %v855_v29  ;;  %435 = vmatpush.bf16.msra.mxu1 %v859_v33  ;;  %v835_v50 = vor.u32 %v981_v42, %v832_v43  ;;  %v792_v51 = vld [vmem:[#allocation4 + $0xe0] sm:$0xf0]  ;;  %v798_v52 = vld [vmem:[#allocation4 + $0xc8] sm:$0xf]  ;;  %v973_v54 = vld [vmem:[#allocation4 + $0xcc] sm:$0xf]  ;;  %v791_v56 = vor.u32 %v976_v48, %v790_v47 }
  0x13   :  { %448 = vmatpush.bf16.msra.mxu2 %v863_v34  ;;  %v977_v53 = vld [vmem:[#allocation4 + $0xe4] sm:$0xf0]  ;;  %v800_v55 = vld [vmem:[#allocation4 + $0xe8] sm:$0xf0]  ;;  %v795_v57 = vor.u32 %v972_v49, %v792_v51  ;;  %v758_v59 = vld [vmem:[#allocation4 + $0x80] sm:$0xf] }
  0x14   :  { %461 = vmatpush.bf16.msra.mxu3 %v867_v38  ;;  %v799_v58 = vor.u32 %v977_v53, %v798_v52  ;;  %v968_v60 = vld [vmem:[#allocation4 + $0x9c] sm:$0xf0]  ;;  %v964_v61 = vld [vmem:[#allocation4 + $0x84] sm:$0xf]  ;;  %v803_v62 = vor.u32 %v973_v54, %v800_v55  ;;  %v766_v0 = vld [vmem:[#allocation4 + $0x88] sm:$0xf] }
  0x15   :  { %v760_v63 = vld [vmem:[#allocation4 + $0xa0] sm:$0xf0]  ;;  %v969_v1 = vld [vmem:[#allocation4 + $0xa4] sm:$0xf0]  ;;  %v965_v2 = vld [vmem:[#allocation4 + $0x8c] sm:$0xf]  ;;  %v759_v4 = vor.u32 %v968_v60, %v758_v59 }
  0x16   :  { %423 = vmatpush.bf16.msra.mxu0 %v823_v44  ;;  %436 = vmatpush.bf16.msra.mxu1 %v827_v45  ;;  %v768_v3 = vld [vmem:[#allocation4 + $0xa8] sm:$0xf0]  ;;  %v763_v5 = vor.u32 %v964_v61, %v760_v63  ;;  %v767_v6 = vor.u32 %v969_v1, %v766_v0  ;;  %v726_v7 = vld [vmem:[#allocation4 + $0x40] sm:$0xf]  ;;  %v956_v9 = vld [vmem:[#allocation4 + $0x44] sm:$0xf] }
  0x17   :  { %449 = vmatpush.bf16.msra.mxu2 %v831_v46  ;;  %v960_v8 = vld [vmem:[#allocation4 + $0x5c] sm:$0xf0]  ;;  %v771_v10 = vor.u32 %v965_v2, %v768_v3  ;;  %v728_v11 = vld [vmem:[#allocation4 + $0x60] sm:$0xf0]  ;;  %v734_v12 = vld [vmem:[#allocation4 + $0x48] sm:$0xf] }
  0x18   :  { %462 = vmatpush.bf16.msra.mxu3 %v835_v50  ;;  %v961_v13 = vld [vmem:[#allocation4 + $0x64] sm:$0xf0]  ;;  %v957_v14 = vld [vmem:[#allocation4 + $0x4c] sm:$0xf]  ;;  %v727_v16 = vor.u32 %v960_v8, %v726_v7  ;;  %v694_v17 = vld [vmem:[#allocation4] sm:$0xf]  ;;  %v731_v19 = vor.u32 %v956_v9, %v728_v11 }
  0x19   :  { %v736_v15 = vld [vmem:[#allocation4 + $0x68] sm:$0xf0]  ;;  %v952_v18 = vld [vmem:[#allocation4 + $0x1c] sm:$0xf0]  ;;  %v735_v20 = vor.u32 %v961_v13, %v734_v12  ;;  %v948_v21 = vld [vmem:[#allocation4 + $0x4] sm:$0xf] }
  0x1a   :  { %424 = vmatpush.bf16.msra.mxu0 %v791_v56  ;;  %437 = vmatpush.bf16.msra.mxu1 %v795_v57  ;;  %v696_v22 = vld [vmem:[#allocation4 + $0x20] sm:$0xf0]  ;;  %v702_v23 = vld [vmem:[#allocation4 + $0x8] sm:$0xf]  ;;  %v739_v24 = vor.u32 %v957_v14, %v736_v15  ;;  %v949_v26 = vld [vmem:[#allocation4 + $0xc] sm:$0xf]  ;;  %v695_v31 = vor.u32 %v952_v18, %v694_v17 }
  0x1b   :  { %450 = vmatpush.bf16.msra.mxu2 %v799_v58  ;;  %v953_v25 = vld [vmem:[#allocation4 + $0x24] sm:$0xf0]  ;;  %v704_v27 = vld [vmem:[#allocation4 + $0x28] sm:$0xf0]  ;;  %v934_v28 = vld [vmem:[#allocation4 + $0x1d0] sm:$0xf]  ;;  %v699_v35 = vor.u32 %v948_v21, %v696_v22 }
  0x1c   :  { %463 = vmatpush.bf16.msra.mxu3 %v803_v62  ;;  %v1010_v29 = vld [vmem:[#allocation4 + $0x1ec] sm:$0xf0]  ;;  %v1006_v30 = vld [vmem:[#allocation4 + $0x1d4] sm:$0xf]  ;;  %v942_v33 = vld [vmem:[#allocation4 + $0x1d8] sm:$0xf]  ;;  %v703_v36 = vor.u32 %v953_v25, %v702_v23  ;;  %v707_v39 = vor.u32 %v949_v26, %v704_v27 }
  0x1d   :  { %v936_v32 = vld [vmem:[#allocation4 + $0x1f0] sm:$0xf0]  ;;  %v1011_v34 = vld [vmem:[#allocation4 + $0x1f4] sm:$0xf0]  ;;  %v1007_v37 = vld [vmem:[#allocation4 + $0x1dc] sm:$0xf]  ;;  %v935_v40 = vor.u32 %v1010_v29, %v934_v28 }
  0x1e   :  { %425 = vmatpush.bf16.msra.mxu0 %v759_v4  ;;  %438 = vmatpush.bf16.msra.mxu1 %v763_v5  ;;  %v944_v38 = vld [vmem:[#allocation4 + $0x1f8] sm:$0xf0]  ;;  %v939_v41 = vor.u32 %v1006_v30, %v936_v32  ;;  %v943_v42 = vor.u32 %v1011_v34, %v942_v33  ;;  %v902_v43 = vld [vmem:[#allocation4 + $0x190] sm:$0xf]  ;;  %v998_v45 = vld [vmem:[#allocation4 + $0x194] sm:$0xf] }
  0x1f   :  { %451 = vmatpush.bf16.msra.mxu2 %v767_v6  ;;  %v1002_v44 = vld [vmem:[#allocation4 + $0x1ac] sm:$0xf0]  ;;  %v947_v46 = vor.u32 %v1007_v37, %v944_v38  ;;  %v904_v47 = vld [vmem:[#allocation4 + $0x1b0] sm:$0xf0]  ;;  %v910_v48 = vld [vmem:[#allocation4 + $0x198] sm:$0xf] }
  0x20   :  { %464 = vmatpush.bf16.msra.mxu3 %v771_v10  ;;  %v1003_v49 = vld [vmem:[#allocation4 + $0x1b4] sm:$0xf0]  ;;  %v999_v50 = vld [vmem:[#allocation4 + $0x19c] sm:$0xf]  ;;  %v1138_v52 = vld [vmem:[%s1195_s0] sm:$0xf]  ;;  %v903_v53 = vor.u32 %v1002_v44, %v902_v43  ;;  %v907_v54 = vor.u32 %v998_v45, %v904_v47 }
  0x21   :  { %v912_v51 = vld [vmem:[#allocation4 + $0x1b8] sm:$0xf0]  ;;  %v911_v55 = vor.u32 %v1003_v49, %v910_v48  ;;  %v870_v56 = vld [vmem:[#allocation4 + $0x150] sm:$0xf]  ;;  %v990_v58 = vld [vmem:[#allocation4 + $0x154] sm:$0xf] }
  0x22   :  { %426 = vmatpush.bf16.msra.mxu0 %v727_v16  ;;  %439 = vmatpush.bf16.msra.mxu1 %v731_v19  ;;  %v994_v57 = vld [vmem:[#allocation4 + $0x16c] sm:$0xf0]  ;;  %v915_v59 = vor.u32 %v999_v50, %v912_v51  ;;  %v872_v60 = vld [vmem:[#allocation4 + $0x170] sm:$0xf0]  ;;  %v878_v61 = vld [vmem:[#allocation4 + $0x158] sm:$0xf] }
  0x23   :  { %452 = vmatpush.bf16.msra.mxu2 %v735_v20  ;;  %v995_v62 = vld [vmem:[#allocation4 + $0x174] sm:$0xf0]  ;;  %v991_v63 = vld [vmem:[#allocation4 + $0x15c] sm:$0xf]  ;;  %v871_v1 = vor.u32 %v994_v57, %v870_v56  ;;  %v875_v2 = vor.u32 %v990_v58, %v872_v60  ;;  %v838_v4 = vld [vmem:[#allocation4 + $0x110] sm:$0xf] }
  0x24   :  { %465 = vmatpush.bf16.msra.mxu3 %v739_v24  ;;  %v880_v0 = vld [vmem:[#allocation4 + $0x178] sm:$0xf0]  ;;  %v879_v3 = vor.u32 %v995_v62, %v878_v61  ;;  %v986_v5 = vld [vmem:[#allocation4 + $0x12c] sm:$0xf0]  ;;  %v982_v6 = vld [vmem:[#allocation4 + $0x114] sm:$0xf] }
  0x25   :  { %v883_v7 = vor.u32 %v991_v63, %v880_v0  ;;  %v840_v8 = vld [vmem:[#allocation4 + $0x130] sm:$0xf0]  ;;  %v846_v9 = vld [vmem:[#allocation4 + $0x118] sm:$0xf]  ;;  %v983_v11 = vld [vmem:[#allocation4 + $0x11c] sm:$0xf]  ;;  %v839_v13 = vor.u32 %v986_v5, %v838_v4 }
  0x26   :  { %427 = vmatpush.bf16.msra.mxu0 %v695_v31  ;;  %440 = vmatpush.bf16.msra.mxu1 %v699_v35  ;;  %v987_v10 = vld [vmem:[#allocation4 + $0x134] sm:$0xf0]  ;;  %v848_v12 = vld [vmem:[#allocation4 + $0x138] sm:$0xf0]  ;;  %v843_v14 = vor.u32 %v982_v6, %v840_v8  ;;  %v806_v16 = vld [vmem:[#allocation4 + $0xd0] sm:$0xf] }
  0x27   :  { %453 = vmatpush.bf16.msra.mxu2 %v703_v36  ;;  %v847_v15 = vor.u32 %v987_v10, %v846_v9  ;;  %v978_v17 = vld [vmem:[#allocation4 + $0xec] sm:$0xf0]  ;;  %v974_v18 = vld [vmem:[#allocation4 + $0xd4] sm:$0xf]  ;;  %v851_v19 = vor.u32 %v983_v11, %v848_v12  ;;  %v814_v21 = vld [vmem:[#allocation4 + $0xd8] sm:$0xf] }
  0x28   :  { %466 = vmatpush.bf16.msra.mxu3 %v707_v39  ;;  %v808_v20 = vld [vmem:[#allocation4 + $0xf0] sm:$0xf0]  ;;  %v979_v22 = vld [vmem:[#allocation4 + $0xf4] sm:$0xf0]  ;;  %v975_v23 = vld [vmem:[#allocation4 + $0xdc] sm:$0xf]  ;;  %v807_v25 = vor.u32 %v978_v17, %v806_v16 }
  0x29   :  { %428 = vmatmul.bf16.vlgmr.msra.gmra.mxu0 %v1138_v52  ;;  %441 = vmatmul.bf16.vlgmr.msra.gmra.mxu1 %v1138_v52  ;;  %v816_v24 = vld [vmem:[#allocation4 + $0xf8] sm:$0xf0]  ;;  %v811_v26 = vor.u32 %v974_v18, %v808_v20  ;;  %v815_v27 = vor.u32 %v979_v22, %v814_v21  ;;  %v774_v28 = vld [vmem:[#allocation4 + $0x90] sm:$0xf]  ;;  %v966_v30 = vld [vmem:[#allocation4 + $0x94] sm:$0xf] }
  0x2a   :  { %472 = vmatpush.bf16.msrb.mxu0 %v935_v40  ;;  %485 = vmatpush.bf16.msrb.mxu1 %v939_v41  ;;  %v970_v29 = vld [vmem:[#allocation4 + $0xac] sm:$0xf0]  ;;  %v819_v31 = vor.u32 %v975_v23, %v816_v24  ;;  %v776_v32 = vld [vmem:[#allocation4 + $0xb0] sm:$0xf0]  ;;  %v782_v33 = vld [vmem:[#allocation4 + $0x98] sm:$0xf] }
  0x2b   :  { %498 = vmatpush.bf16.msrb.mxu2 %v943_v42  ;;  %467 = vmatmul.bf16.vlgmr.msra.gmra.mxu3 %v1138_v52  ;;  %v971_v34 = vld [vmem:[#allocation4 + $0xb4] sm:$0xf0]  ;;  %v967_v35 = vld [vmem:[#allocation4 + $0x9c] sm:$0xf]  ;;  %v775_v37 = vor.u32 %v970_v29, %v774_v28  ;;  %v779_v38 = vor.u32 %v966_v30, %v776_v32  ;;  %v742_v40 = vld [vmem:[#allocation4 + $0x50] sm:$0xf] }
  0x2c   :  { %511 = vmatpush.bf16.msrb.mxu3 %v947_v46  ;;  %454 = vmatmul.bf16.vlgmr.msra.gmra.mxu2 %v1138_v52  ;;  %v784_v36 = vld [vmem:[#allocation4 + $0xb8] sm:$0xf0]  ;;  %v783_v39 = vor.u32 %v971_v34, %v782_v33  ;;  %v962_v41 = vld [vmem:[#allocation4 + $0x6c] sm:$0xf0]  ;;  %v958_v42 = vld [vmem:[#allocation4 + $0x54] sm:$0xf] }
  0x2d   :  { %v787_v43 = vor.u32 %v967_v35, %v784_v36  ;;  %v744_v44 = vld [vmem:[#allocation4 + $0x70] sm:$0xf0]  ;;  %v750_v45 = vld [vmem:[#allocation4 + $0x58] sm:$0xf]  ;;  %v959_v47 = vld [vmem:[#allocation4 + $0x5c] sm:$0xf]  ;;  %v743_v49 = vor.u32 %v962_v41, %v742_v40 }
  0x2e   :  { %473 = vmatpush.bf16.msrb.mxu0 %v903_v53  ;;  %486 = vmatpush.bf16.msrb.mxu1 %v907_v54  ;;  %v963_v46 = vld [vmem:[#allocation4 + $0x74] sm:$0xf0]  ;;  %v752_v48 = vld [vmem:[#allocation4 + $0x78] sm:$0xf0]  ;;  %v747_v50 = vor.u32 %v958_v42, %v744_v44  ;;  %v710_v53 = vld [vmem:[#allocation4 + $0x10] sm:$0xf] }
  0x2f   :  { %499 = vmatpush.bf16.msrb.mxu2 %v911_v55  ;;  %v751_v51 = vor.u32 %v963_v46, %v750_v45  ;;  %v954_v54 = vld [vmem:[#allocation4 + $0x2c] sm:$0xf0]  ;;  %v950_v55 = vld [vmem:[#allocation4 + $0x14] sm:$0xf]  ;;  %v755_v56 = vor.u32 %v959_v47, %v752_v48  ;;  %v718_v58 = vld [vmem:[#allocation4 + $0x18] sm:$0xf] }
  0x30   :  { %512 = vmatpush.bf16.msrb.mxu3 %v915_v59  ;;  %v712_v57 = vld [vmem:[#allocation4 + $0x30] sm:$0xf0]  ;;  %v955_v59 = vld [vmem:[#allocation4 + $0x34] sm:$0xf0]  ;;  %v951_v60 = vld [vmem:[#allocation4 + $0x1c] sm:$0xf]  ;;  %v711_v62 = vor.u32 %v954_v54, %v710_v53 }
  0x31   :  { %v720_v61 = vld [vmem:[#allocation4 + $0x38] sm:$0xf0]  ;;  %v715_v63 = vor.u32 %v950_v55, %v712_v57  ;;  %v719_v0 = vor.u32 %v955_v59, %v718_v58  ;;  %vm32_vm0 = vcmask 7168   ;;  %v1113_v9 = vmov -inf   ;;  %s1116_s0 = smov [#allocation7]   ;;  %s680_s20 = sshll.u32 %s1197_s2, 4  ;;  %s681_s20 = int_to_ptr.hbm [resolvable:$true] %s680_s20 }
  0x32   :  { %474 = vmatpush.bf16.msrb.mxu0 %v871_v1  ;;  %487 = vmatpush.bf16.msrb.mxu1 %v875_v2  ;;  %v723_v1 = vor.u32 %v951_v60, %v720_v61  ;;  %33 = vst.msk [vmem:[#allocation2] sm:$0xff] %vm32_vm0, %v1113_v9  ;;  %s678_s17 = sshll.u32 %s1116_s0, 4  ;;  %s679_s17 = int_to_ptr.vmem [resolvable:$true] %s678_s17 }
  0x33   :  { %500 = vmatpush.bf16.msrb.mxu2 %v879_v3 }
  0x34   :  { %513 = vmatpush.bf16.msrb.mxu3 %v883_v7 }
  0x36   :  { %475 = vmatpush.bf16.msrb.mxu0 %v839_v13  ;;  %488 = vmatpush.bf16.msrb.mxu1 %v843_v14 }
  0x37   :  { %501 = vmatpush.bf16.msrb.mxu2 %v847_v15 }
  0x38   :  { %514 = vmatpush.bf16.msrb.mxu3 %v851_v19 }
  0x3a   :  { %476 = vmatpush.bf16.msrb.mxu0 %v807_v25  ;;  %489 = vmatpush.bf16.msrb.mxu1 %v811_v26  ;;  %v1114_v25 = vmov 0   ;;  %v1115_v26 = vmov 0.0  }
  0x3b   :  { %502 = vmatpush.bf16.msrb.mxu2 %v815_v27  ;;  %1019 = vset.pattern.permute.xlu0 %v1114_v25  ;;  %34 = vst.msk [vmem:[#allocation3] sm:$0xff] %vm32_vm0, %v1115_v26  ;;  %v537_v27 = vld [vmem:[#allocation2] sm:$0xff] }
  0x3c   :  { %515 = vmatpush.bf16.msrb.mxu3 %v819_v31  ;;  %1020 = vset.pattern.permute.xlu1 %v1114_v25 }
  0x3d   :  { %1021 = vset.pattern.permute.xlu2 %v1114_v25 }
  0x3e   :  { %477 = vmatpush.bf16.msrb.mxu0 %v775_v37  ;;  %490 = vmatpush.bf16.msrb.mxu1 %v779_v38 }
  0x3f   :  { %503 = vmatpush.bf16.msrb.mxu2 %v783_v39 }
  0x40   :  { %516 = vmatpush.bf16.msrb.mxu3 %v787_v43 }
  0x42   :  { %478 = vmatpush.bf16.msrb.mxu0 %v743_v49  ;;  %491 = vmatpush.bf16.msrb.mxu1 %v747_v50 }
  0x43   :  { %504 = vmatpush.bf16.msrb.mxu2 %v751_v51 }
  0x44   :  { %517 = vmatpush.bf16.msrb.mxu3 %v755_v56 }
  0x46   :  { %479 = vmatpush.bf16.msrb.mxu0 %v711_v62  ;;  %492 = vmatpush.bf16.msrb.mxu1 %v715_v63 }
  0x47   :  { %505 = vmatpush.bf16.msrb.mxu2 %v719_v0 }
  0x48   :  { %518 = vmatpush.bf16.msrb.mxu3 %v723_v1 }
  0x49   :  { %480 = vmatmul.bf16.vlgmr.msrb.gmra.mxu0 %v1138_v52  ;;  %493 = vmatmul.bf16.vlgmr.msrb.gmra.mxu1 %v1138_v52 }
  0x4a   :  { %506 = vmatmul.bf16.vlgmr.msrb.gmra.mxu2 %v1138_v52 }
  0x4b   :  { %519 = vmatmul.bf16.vlgmr.msrb.gmra.mxu3 %v1138_v52 }
  0xa6   :  { %v1148_v2 = vpop.f32.mrf.mxu0  ;;  %v1150_v3 = vpop.f32.mrf.mxu1 }
  0xae   :  { %v1154_v5 = vpop.f32.mrf.mxu3  ;;  %v431_v6 = vpop.f32.mrf.mxu0 }
  0xaf   :  { %v1152_v4 = vpop.f32.mrf.mxu2  ;;  %v444_v7 = vpop.f32.mrf.mxu1 }
  0xb0   :  { %v548_v7 = vld [vmem:[#allocation3] sm:$0xff] }
  0xb6   :  { %v470_v10 = vpop.f32.mrf.mxu3 }
  0xb7   :  { %v457_v8 = vpop.f32.mrf.mxu2 }
  0xc6   :  { %v1157_v11 = vpop.f32.mrf.mxu0  ;;  %v1159_v12 = vpop.f32.mrf.mxu1 }
  0xc7   :  { %v538_v52 = vmax.f32 %v1148_v2, %v1157_v11  ;;  %v539_v13 = vmax.f32 %v1150_v3, %v1159_v12 }
  0xc9   :  { %v542_v20 = vmax.f32 %v538_v52, %v539_v13 }
  0xcd   :  { %v1165_v14 = vpop.f32.mrf.mxu2 }
  0xce   :  { %v540_v15 = vmax.f32 %v1152_v4, %v1165_v14  ;;  %v1169_v16 = vpop.f32.mrf.mxu3  ;;  %v483_v17 = vpop.f32.mrf.mxu0 }
  0xcf   :  { %v541_v18 = vmax.f32 %v1154_v5, %v1169_v16  ;;  %v496_v19 = vpop.f32.mrf.mxu1 }
  0xd1   :  { %v543_v21 = vmax.f32 %v540_v15, %v541_v18 }
  0xd3   :  { %v544_v22 = vmax.f32 %v542_v20, %v543_v21 }
  0xd5   :  { %545 = vmax.xlane.f32.xlu0 %v544_v22  ;;  %v509_v23 = vpop.f32.mrf.mxu2 }
  0xd6   :  { %v522_v24 = vpop.f32.mrf.mxu3 }
 0x148   :  { %v546_v28 = vpop.xlane.xlu0 %545 }
 0x149   :  { %v547_v29 = vmax.f32 %v537_v27, %v546_v28 }
 0x14b   :  { %v549_v30 = vsub.f32 %v537_v27, %v547_v29  ;;  %594 = vst.msk [vmem:[#allocation2] sm:$0xff] %vm32_vm0, %v547_v29  ;;  %555 = vperm.xlu0 %1019, %v547_v29  }
 0x14d   :  { %v550_v1 = vmul.f32 1.442695, %v549_v30 }
 0x152   :  { %v598_v0 = vld [vmem:[#allocation2] sm:$0xff] }
 0x1bd   :  { %v556_v31 = vpop.permute.xlu0 %555 }
 0x1be   :  { %v558_v32 = vsub.f32 %v1148_v2, %v556_v31  ;;  %v559_v33 = vsub.f32 %v1150_v3, %v556_v31  ;;  %v560_v34 = vsub.f32 %v1152_v4, %v556_v31  ;;  %v561_v35 = vsub.f32 %v1154_v5, %v556_v31 }
 0x1bf   :  { %v562_v39 = vsub.f32 %v1157_v11, %v556_v31  ;;  %v563_v40 = vsub.f32 %v1159_v12, %v556_v31  ;;  %v564_v42 = vsub.f32 %v1165_v14, %v556_v31  ;;  %v565_v44 = vsub.f32 %v1169_v16, %v556_v31 }
 0x1c0   :  { %v566_v36 = vmul.f32 1.442695, %v558_v32  ;;  %v568_v37 = vmul.f32 1.442695, %v559_v33  ;;  %v570_v38 = vmul.f32 1.442695, %v560_v34 }
 0x1c1   :  { %v572_v41 = vmul.f32 1.442695, %v561_v35  ;;  %v574_v43 = vmul.f32 1.442695, %v562_v39  ;;  %v576_v45 = vmul.f32 1.442695, %v563_v40 }
 0x1c2   :  { %1022 = vpow2.f32 %v566_v36  ;;  %v578_v48 = vmul.f32 1.442695, %v564_v42  ;;  %v580_v51 = vmul.f32 1.442695, %v565_v44 }
 0x1c3   :  { %1024 = vpow2.f32 %v568_v37 }
 0x1c4   :  { %1026 = vpow2.f32 %v570_v38 }
 0x1c5   :  { %1028 = vpow2.f32 %v572_v41 }
 0x1c6   :  { %1030 = vpow2.f32 %v574_v43 }
 0x1c7   :  { %1032 = vpow2.f32 %v576_v45 }
 0x1c8   :  { %v1023_v46 = vpop.eup %1022  ;;  %1034 = vpow2.f32 %v578_v48 }
 0x1c9   :  { %v1025_v47 = vpop.eup %1024  ;;  %1036 = vpow2.f32 %v580_v51 }
 0x1ca   :  { %v582_v49 = vadd.f32 %v1025_v47, %v1023_v46  ;;  %v1027_v50 = vpop.eup %1026  ;;  %1038 = vpow2.f32 %v550_v1 }
 0x1cb   :  { %v1029_v54 = vpop.eup %1028 }
 0x1cc   :  { %v583_v53 = vadd.f32 %v1027_v50, %v582_v49  ;;  %v1031_v56 = vpop.eup %1030 }
 0x1cd   :  { %v1033_v58 = vpop.eup %1032 }
 0x1ce   :  { %v584_v55 = vadd.f32 %v1029_v54, %v583_v53  ;;  %v1035_v60 = vpop.eup %1034 }
 0x1cf   :  { %v1037_v62 = vpop.eup %1036 }
 0x1d0   :  { %v585_v57 = vadd.f32 %v1031_v56, %v584_v55  ;;  %v1039_v6 = vpop.eup %1038 }
 0x1d1   :  { %v552_v8 = vmul.f32 %v1039_v6, %v548_v7 }
 0x1d2   :  { %v586_v59 = vadd.f32 %v1033_v58, %v585_v57 }
 0x1d4   :  { %v587_v61 = vadd.f32 %v1035_v60, %v586_v59 }
 0x1d6   :  { %v588_v63 = vadd.f32 %v1037_v62, %v587_v61 }
 0x1d8   :  { %589 = vadd.xlane.f32.xlu1 %v588_v63 }
 0x1f1   :  { %625 = vperm.xlu1 %1020, %v598_v0  }
 0x24b   :  { %v590_v9 = vpop.xlane.xlu1 %589 }
 0x24c   :  { %v591_v10 = vadd.f32 %v590_v9, %v552_v8 }
 0x24e   :  { %593 = vst.msk [vmem:[#allocation3] sm:$0xff] %vm32_vm0, %v591_v10 }
 0x255   :  { %v599_v52 = vld [vmem:[#allocation3] sm:$0xff] }
 0x256   :  { %1040 = vrcp.f32 %v599_v52  ;;  %v611_v19 = vand.u32 2147483648, %v599_v52  ;;  %v609_v20 = vand.u32 2147483647, %v599_v52  ;;  %vm605_vm2 = vweird.f32 %v599_v52 }
 0x258   :  { %v612_v22 = vor.u32 1.1754944e-38, %v611_v19  ;;  %vm610_vm4 = vcmp.eq.f32.partialorder %v609_v20, 8.507059e+37 }
 0x25c   :  { %v1041_v13 = vpop.eup %1040 }
 0x25d   :  { %v601_v15 = vmul.f32 %v1041_v13, %v599_v52  ;;  %vm606_vm1 = vweird.f32 %v1041_v13 }
 0x25e   :  { %vm607_vm3 = vmor %vm605_vm2, %vm606_vm1 }
 0x25f   :  { %v602_v17 = vsub.f32 1.0, %v601_v15 }
 0x261   :  { %v603_v18 = vmul.f32 %v1041_v13, %v602_v17 }
 0x263   :  { %v604_v21 = vadd.f32 %v1041_v13, %v603_v18  ;;  %v626_v25 = vpop.permute.xlu1 %625 }
 0x264   :  { %v628_v26 = vsub.f32 %v1148_v2, %v626_v25  ;;  %v629_v27 = vsub.f32 %v1150_v3, %v626_v25  ;;  %v630_v28 = vsub.f32 %v1152_v4, %v626_v25  ;;  %v631_v29 = vsub.f32 %v1154_v5, %v626_v25 }
 0x265   :  { %v608_v23 = vsel %vm607_vm3, %v1041_v13, %v604_v21  ;;  %v632_v30 = vsub.f32 %v1157_v11, %v626_v25  ;;  %v633_v32 = vsub.f32 %v1159_v12, %v626_v25  ;;  %v634_v34 = vsub.f32 %v1165_v14, %v626_v25 }
 0x266   :  { %v613_v24 = vsel %vm610_vm4, %v612_v22, %v608_v23  ;;  %v636_v31 = vmul.f32 1.442695, %v628_v26  ;;  %v638_v33 = vmul.f32 1.442695, %v629_v27  ;;  %v640_v35 = vmul.f32 1.442695, %v630_v28 }
 0x267   :  { %654 = vperm.xlu2 %1021, %v613_v24   ;;  %v635_v36 = vsub.f32 %v1169_v16, %v626_v25  ;;  %v642_v37 = vmul.f32 1.442695, %v631_v29  ;;  %v644_v2 = vmul.f32 1.442695, %v632_v30  ;;  %v646_v3 = vmul.f32 1.442695, %v633_v32 }
 0x268   :  { %1042 = vpow2.f32 %v636_v31  ;;  %v648_v4 = vmul.f32 1.442695, %v634_v34 }
 0x269   :  { %1044 = vpow2.f32 %v638_v33  ;;  %v650_v5 = vmul.f32 1.442695, %v635_v36 }
 0x26a   :  { %1046 = vpow2.f32 %v640_v35 }
 0x26b   :  { %1048 = vpow2.f32 %v642_v37 }
 0x26c   :  { %1050 = vpow2.f32 %v644_v2 }
 0x26d   :  { %1052 = vpow2.f32 %v646_v3 }
 0x26e   :  { %v1043_v11 = vpop.eup %1042  ;;  %1054 = vpow2.f32 %v648_v4 }
 0x26f   :  { %v1045_v12 = vpop.eup %1044  ;;  %1056 = vpow2.f32 %v650_v5 }
 0x270   :  { %v1047_v38 = vpop.eup %1046 }
 0x271   :  { %v1049_v39 = vpop.eup %1048 }
 0x272   :  { %v1051_v42 = vpop.eup %1050 }
 0x273   :  { %v1053_v44 = vpop.eup %1052 }
 0x274   :  { %v1055_v46 = vpop.eup %1054 }
 0x275   :  { %v1057_v48 = vpop.eup %1056 }
 0x2c1   :  { %v655_v14 = vpop.permute.xlu2 %654 }
 0x2c2   :  { %v657_v40 = vmul.f32 %v1043_v11, %v655_v14  ;;  %v658_v16 = vmul.f32 %v1045_v12, %v655_v14  ;;  %v659_v41 = vmul.f32 %v1047_v38, %v655_v14  ;;  %v660_v43 = vmul.f32 %v1049_v39, %v655_v14 }
 0x2c3   :  { %v661_v45 = vmul.f32 %v1051_v42, %v655_v14  ;;  %v662_v47 = vmul.f32 %v1053_v44, %v655_v14  ;;  %v663_v49 = vmul.f32 %v1055_v46, %v655_v14  ;;  %v664_v50 = vmul.f32 %v1057_v48, %v655_v14 }
 0x2c4   :  { %665 = vst [vmem:[#allocation7] sm:$0xff] %v657_v40 }
 0x2c5   :  { %666 = vst [vmem:[#allocation7 + $0x8] sm:$0xff] %v658_v16 }
 0x2c6   :  { %667 = vst [vmem:[#allocation7 + $0x10] sm:$0xff] %v659_v41 }
 0x2c7   :  { %668 = vst [vmem:[#allocation7 + $0x18] sm:$0xff] %v660_v43 }
 0x2c8   :  { %669 = vst [vmem:[#allocation7 + $0x20] sm:$0xff] %v661_v45 }
 0x2c9   :  { %670 = vst [vmem:[#allocation7 + $0x28] sm:$0xff] %v662_v47 }
 0x2ca   :  { %671 = vst [vmem:[#allocation7 + $0x30] sm:$0xff] %v663_v49 }
 0x2cb   :  { %672 = vst [vmem:[#allocation7 + $0x38] sm:$0xff] %v664_v50 }
 0x2cc   :  { %683 = dma.vmem_to_hbm [thread:$0]  %s679_s17, 1024, %s681_s20, [#allocation6]  }
 0x2cd   :  { %1108 = dma.done.wait [#allocation6], 1024  }
 0x2ce   :  { %1109 = vsyncadd [#allocation6], 4294966272 }
 0x2cf   :  { %688 = vsyncpa [#allocation5], 1 }
 0x2d0   :  { %689 = vsyncpa [#allocation6], 1 }

// kernel: mikolov_bi_sg_forward.2
= control target key start
LH: loop header
LB: loop body
LE: loop exit
PB: predicated region body
PF: predicated region fallthrough
CT: control target
= control target key end

     0   :  { %7 = vsyncpa [#allocation4], 0  ;;  %s1043_s12 = smov [#allocation3]   ;;  %s1044_s14 = smov 64   ;;  %s1079_s0 = inlined_call_operand.vmem [shape: bf16[8,1024], index: 0, kind: input, shape index: {}]   ;;  %s1080_s1 = inlined_call_operand.hbm [shape: bf16[1024,128], index: 1, kind: input, shape index: {}]   ;;  %s1081_s2 = inlined_call_operand.vmem [shape: bf16[8,128], index: 2, kind: output, shape index: {}]  }
   0x1   :  { %s14_s11 = sshll.u32 %s1080_s1, 4  ;;  %s16_s13 = sshll.u32 %s1043_s12, 4  ;;  %s15_s11 = int_to_ptr.hbm [resolvable:$true] %s14_s11  ;;  %s17_s13 = int_to_ptr.vmem [resolvable:$true] %s16_s13 }
   0x2   :  { %s1045_s15 = smov 4  }
   0x3   :  { %22 = dma.hbm_to_vmem [thread:$0]  %s15_s11, 8192, %s17_s13, [#allocation4], %s1044_s14, %s1044_s14, %s1045_s15  }
   0x4   :  { %1041 = dma.done.wait [#allocation4], 8192  }
   0x5   :  { %1042 = vsyncadd [#allocation4], 4294959104  ;;  %v957_v0 = vld [vmem:[#allocation3 + $0x38] sm:$0xff]  ;;  %v956_v4 = vld [vmem:[#allocation3 + $0x30] sm:$0xff] }
   0x6   :  { %v965_v1 = vld [vmem:[#allocation3 + $0x78] sm:$0xff]  ;;  %577 = vmatpush.bf16.msra.mxu0 %v957_v0  ;;  %v964_v5 = vld [vmem:[#allocation3 + $0x70] sm:$0xff]  ;;  %v955_v8 = vld [vmem:[#allocation3 + $0x28] sm:$0xff] }
   0x7   :  { %v973_v2 = vld [vmem:[#allocation3 + $0xb8] sm:$0xff]  ;;  %590 = vmatpush.bf16.msra.mxu1 %v965_v1  ;;  %v972_v6 = vld [vmem:[#allocation3 + $0xb0] sm:$0xff]  ;;  %v963_v9 = vld [vmem:[#allocation3 + $0x68] sm:$0xff] }
   0x8   :  { %v981_v3 = vld [vmem:[#allocation3 + $0xf8] sm:$0xff]  ;;  %603 = vmatpush.bf16.msra.mxu2 %v973_v2  ;;  %v980_v7 = vld [vmem:[#allocation3 + $0xf0] sm:$0xff]  ;;  %v971_v10 = vld [vmem:[#allocation3 + $0xa8] sm:$0xff] }
   0x9   :  { %616 = vmatpush.bf16.msra.mxu3 %v981_v3  ;;  %v979_v11 = vld [vmem:[#allocation3 + $0xe8] sm:$0xff]  ;;  %v954_v12 = vld [vmem:[#allocation3 + $0x20] sm:$0xff]  ;;  %v953_v16 = vld [vmem:[#allocation3 + $0x18] sm:$0xff] }
   0xa   :  { %578 = vmatpush.bf16.msra.mxu0 %v956_v4  ;;  %v962_v13 = vld [vmem:[#allocation3 + $0x60] sm:$0xff]  ;;  %v961_v17 = vld [vmem:[#allocation3 + $0x58] sm:$0xff]  ;;  %v952_v20 = vld [vmem:[#allocation3 + $0x10] sm:$0xff] }
   0xb   :  { %591 = vmatpush.bf16.msra.mxu1 %v964_v5  ;;  %v970_v14 = vld [vmem:[#allocation3 + $0xa0] sm:$0xff]  ;;  %v969_v18 = vld [vmem:[#allocation3 + $0x98] sm:$0xff]  ;;  %v960_v21 = vld [vmem:[#allocation3 + $0x50] sm:$0xff] }
   0xc   :  { %604 = vmatpush.bf16.msra.mxu2 %v972_v6  ;;  %v978_v15 = vld [vmem:[#allocation3 + $0xe0] sm:$0xff]  ;;  %v977_v19 = vld [vmem:[#allocation3 + $0xd8] sm:$0xff]  ;;  %v968_v22 = vld [vmem:[#allocation3 + $0x90] sm:$0xff] }
   0xd   :  { %617 = vmatpush.bf16.msra.mxu3 %v980_v7  ;;  %v976_v23 = vld [vmem:[#allocation3 + $0xd0] sm:$0xff]  ;;  %v951_v24 = vld [vmem:[#allocation3 + $0x8] sm:$0xff]  ;;  %v33_v29 = vld [vmem:[%s1079_s0] sm:$0xff] }
   0xe   :  { %579 = vmatpush.bf16.msra.mxu0 %v955_v8  ;;  %v959_v25 = vld [vmem:[#allocation3 + $0x48] sm:$0xff]  ;;  %v950_v30 = vld [vmem:[#allocation3] sm:$0xff]  ;;  %v169_v36 = vunpack.c.l.b16 %v33_v29  ;;  %v170_v37 = vunpack.c.h.b16 %v33_v29  ;;  %v989_v38 = vld [vmem:[#allocation3 + $0x138] sm:$0xff] }
   0xf   :  { %592 = vmatpush.bf16.msra.mxu1 %v963_v9  ;;  %v967_v26 = vld [vmem:[#allocation3 + $0x88] sm:$0xff]  ;;  %v958_v31 = vld [vmem:[#allocation3 + $0x40] sm:$0xff]  ;;  %v997_v39 = vld [vmem:[#allocation3 + $0x178] sm:$0xff] }
  0x10   :  { %605 = vmatpush.bf16.msra.mxu2 %v971_v10  ;;  %v975_v27 = vld [vmem:[#allocation3 + $0xc8] sm:$0xff]  ;;  %v966_v34 = vld [vmem:[#allocation3 + $0x80] sm:$0xff]  ;;  %v1005_v40 = vld [vmem:[#allocation3 + $0x1b8] sm:$0xff]  ;;  %v177_v44 = vpack.c.b16 %v169_v36, %v169_v36  ;;  %v178_v45 = vpack.c.b16 %v170_v37, %v170_v37 }
  0x11   :  { %618 = vmatpush.bf16.msra.mxu3 %v979_v11  ;;  %v34_v28 = vld [vmem:[%s1079_s0 + $0x8] sm:$0xff]  ;;  %v974_v35 = vld [vmem:[#allocation3 + $0xc0] sm:$0xff]  ;;  %v1013_v41 = vld [vmem:[#allocation3 + $0x1f8] sm:$0xff] }
  0x12   :  { %580 = vmatpush.bf16.msra.mxu0 %v954_v12  ;;  %v171_v32 = vunpack.c.l.b16 %v34_v28  ;;  %v172_v33 = vunpack.c.h.b16 %v34_v28  ;;  %v988_v46 = vld [vmem:[#allocation3 + $0x130] sm:$0xff]  ;;  %v987_v50 = vld [vmem:[#allocation3 + $0x128] sm:$0xff]  ;;  %v986_v54 = vld [vmem:[#allocation3 + $0x120] sm:$0xff] }
  0x13   :  { %593 = vmatpush.bf16.msra.mxu1 %v962_v13  ;;  %v996_v47 = vld [vmem:[#allocation3 + $0x170] sm:$0xff]  ;;  %v995_v51 = vld [vmem:[#allocation3 + $0x168] sm:$0xff]  ;;  %v994_v55 = vld [vmem:[#allocation3 + $0x160] sm:$0xff] }
  0x14   :  { %606 = vmatpush.bf16.msra.mxu2 %v970_v14  ;;  %v179_v42 = vpack.c.b16 %v171_v32, %v171_v32  ;;  %v180_v43 = vpack.c.b16 %v172_v33, %v172_v33  ;;  %v1004_v48 = vld [vmem:[#allocation3 + $0x1b0] sm:$0xff]  ;;  %v1003_v52 = vld [vmem:[#allocation3 + $0x1a8] sm:$0xff]  ;;  %v1002_v56 = vld [vmem:[#allocation3 + $0x1a0] sm:$0xff] }
  0x15   :  { %619 = vmatpush.bf16.msra.mxu3 %v978_v15  ;;  %v1012_v49 = vld [vmem:[#allocation3 + $0x1f0] sm:$0xff]  ;;  %v1011_v53 = vld [vmem:[#allocation3 + $0x1e8] sm:$0xff]  ;;  %v1010_v57 = vld [vmem:[#allocation3 + $0x1e0] sm:$0xff] }
  0x16   :  { %581 = vmatpush.bf16.msra.mxu0 %v953_v16  ;;  %v985_v58 = vld [vmem:[#allocation3 + $0x118] sm:$0xff]  ;;  %v984_v62 = vld [vmem:[#allocation3 + $0x110] sm:$0xff]  ;;  %v983_v2 = vld [vmem:[#allocation3 + $0x108] sm:$0xff] }
  0x17   :  { %594 = vmatpush.bf16.msra.mxu1 %v961_v17  ;;  %v993_v59 = vld [vmem:[#allocation3 + $0x158] sm:$0xff]  ;;  %v992_v63 = vld [vmem:[#allocation3 + $0x150] sm:$0xff]  ;;  %v991_v3 = vld [vmem:[#allocation3 + $0x148] sm:$0xff] }
  0x18   :  { %607 = vmatpush.bf16.msra.mxu2 %v969_v18  ;;  %v1001_v60 = vld [vmem:[#allocation3 + $0x198] sm:$0xff]  ;;  %v1000_v0 = vld [vmem:[#allocation3 + $0x190] sm:$0xff]  ;;  %v999_v5 = vld [vmem:[#allocation3 + $0x188] sm:$0xff] }
  0x19   :  { %620 = vmatpush.bf16.msra.mxu3 %v977_v19  ;;  %v1009_v61 = vld [vmem:[#allocation3 + $0x1d8] sm:$0xff]  ;;  %v1008_v1 = vld [vmem:[#allocation3 + $0x1d0] sm:$0xff]  ;;  %v1007_v6 = vld [vmem:[#allocation3 + $0x1c8] sm:$0xff] }
  0x1a   :  { %582 = vmatpush.bf16.msra.mxu0 %v952_v20  ;;  %v35_v4 = vld [vmem:[%s1079_s0 + $0x10] sm:$0xff]  ;;  %v36_v7 = vld [vmem:[%s1079_s0 + $0x18] sm:$0xff]  ;;  %v982_v10 = vld [vmem:[#allocation3 + $0x100] sm:$0xff] }
  0x1b   :  { %595 = vmatpush.bf16.msra.mxu1 %v960_v21  ;;  %v173_v8 = vunpack.c.l.b16 %v35_v4  ;;  %v174_v9 = vunpack.c.h.b16 %v35_v4  ;;  %v990_v11 = vld [vmem:[#allocation3 + $0x140] sm:$0xff]  ;;  %v175_v12 = vunpack.c.l.b16 %v36_v7  ;;  %v176_v13 = vunpack.c.h.b16 %v36_v7 }
  0x1c   :  { %608 = vmatpush.bf16.msra.mxu2 %v968_v22  ;;  %v998_v14 = vld [vmem:[#allocation3 + $0x180] sm:$0xff] }
  0x1d   :  { %621 = vmatpush.bf16.msra.mxu3 %v976_v23  ;;  %v1006_v15 = vld [vmem:[#allocation3 + $0x1c0] sm:$0xff]  ;;  %v181_v16 = vpack.c.b16 %v173_v8, %v173_v8  ;;  %v182_v17 = vpack.c.b16 %v174_v9, %v174_v9  ;;  %v183_v18 = vpack.c.b16 %v175_v12, %v175_v12  ;;  %v184_v19 = vpack.c.b16 %v176_v13, %v176_v13 }
  0x1e   :  { %583 = vmatpush.bf16.msra.mxu0 %v951_v24 }
  0x1f   :  { %596 = vmatpush.bf16.msra.mxu1 %v959_v25 }
  0x20   :  { %609 = vmatpush.bf16.msra.mxu2 %v967_v26 }
  0x21   :  { %622 = vmatpush.bf16.msra.mxu3 %v975_v27 }
  0x22   :  { %584 = vmatpush.bf16.msra.mxu0 %v950_v30 }
  0x23   :  { %597 = vmatpush.bf16.msra.mxu1 %v958_v31 }
  0x24   :  { %610 = vmatpush.bf16.msra.mxu2 %v966_v34 }
  0x25   :  { %623 = vmatpush.bf16.msra.mxu3 %v974_v35  ;;  %585 = vmatmul.bf16.vlgmr.msra.gmra.mxu0 %v177_v44 }
  0x26   :  { %629 = vmatpush.bf16.msrb.mxu0 %v989_v38  ;;  %598 = vmatmul.bf16.vlgmr.msra.gmra.mxu1 %v178_v45 }
  0x27   :  { %642 = vmatpush.bf16.msrb.mxu1 %v997_v39  ;;  %611 = vmatmul.bf16.vlgmr.msra.gmra.mxu2 %v179_v42 }
  0x28   :  { %655 = vmatpush.bf16.msrb.mxu2 %v1005_v40  ;;  %624 = vmatmul.bf16.vlgmr.msra.gmra.mxu3 %v180_v43 }
  0x29   :  { %668 = vmatpush.bf16.msrb.mxu3 %v1013_v41 }
  0x2a   :  { %630 = vmatpush.bf16.msrb.mxu0 %v988_v46 }
  0x2b   :  { %643 = vmatpush.bf16.msrb.mxu1 %v996_v47 }
  0x2c   :  { %656 = vmatpush.bf16.msrb.mxu2 %v1004_v48 }
  0x2d   :  { %669 = vmatpush.bf16.msrb.mxu3 %v1012_v49 }
  0x2e   :  { %631 = vmatpush.bf16.msrb.mxu0 %v987_v50 }
  0x2f   :  { %644 = vmatpush.bf16.msrb.mxu1 %v995_v51 }
  0x30   :  { %657 = vmatpush.bf16.msrb.mxu2 %v1003_v52 }
  0x31   :  { %670 = vmatpush.bf16.msrb.mxu3 %v1011_v53 }
  0x32   :  { %632 = vmatpush.bf16.msrb.mxu0 %v986_v54 }
  0x33   :  { %645 = vmatpush.bf16.msrb.mxu1 %v994_v55 }
  0x34   :  { %658 = vmatpush.bf16.msrb.mxu2 %v1002_v56 }
  0x35   :  { %671 = vmatpush.bf16.msrb.mxu3 %v1010_v57 }
  0x36   :  { %633 = vmatpush.bf16.msrb.mxu0 %v985_v58 }
  0x37   :  { %646 = vmatpush.bf16.msrb.mxu1 %v993_v59 }
  0x38   :  { %659 = vmatpush.bf16.msrb.mxu2 %v1001_v60 }
  0x39   :  { %672 = vmatpush.bf16.msrb.mxu3 %v1009_v61 }
  0x3a   :  { %634 = vmatpush.bf16.msrb.mxu0 %v984_v62 }
  0x3b   :  { %647 = vmatpush.bf16.msrb.mxu1 %v992_v63 }
  0x3c   :  { %660 = vmatpush.bf16.msrb.mxu2 %v1000_v0 }
  0x3d   :  { %673 = vmatpush.bf16.msrb.mxu3 %v1008_v1 }
  0x3e   :  { %635 = vmatpush.bf16.msrb.mxu0 %v983_v2 }
  0x3f   :  { %648 = vmatpush.bf16.msrb.mxu1 %v991_v3 }
  0x40   :  { %661 = vmatpush.bf16.msrb.mxu2 %v999_v5 }
  0x41   :  { %674 = vmatpush.bf16.msrb.mxu3 %v1007_v6 }
  0x42   :  { %636 = vmatpush.bf16.msrb.mxu0 %v982_v10 }
  0x43   :  { %649 = vmatpush.bf16.msrb.mxu1 %v990_v11 }
  0x44   :  { %662 = vmatpush.bf16.msrb.mxu2 %v998_v14 }
  0x45   :  { %675 = vmatpush.bf16.msrb.mxu3 %v1006_v15  ;;  %637 = vmatmul.bf16.vlgmr.msrb.gmra.mxu0 %v181_v16 }
  0x46   :  { %650 = vmatmul.bf16.vlgmr.msrb.gmra.mxu1 %v182_v17 }
  0x47   :  { %663 = vmatmul.bf16.vlgmr.msrb.gmra.mxu2 %v183_v18 }
  0x48   :  { %676 = vmatmul.bf16.vlgmr.msrb.gmra.mxu3 %v184_v19 }
  0xa2   :  { %v586_v20 = vpop.f32.mrf.mxu0 }
  0xa3   :  { %v599_v21 = vpop.f32.mrf.mxu1 }
  0xa4   :  { %v600_v28 = vadd.f32 %v599_v21, %v586_v20 }
  0xaa   :  { %v612_v22 = vpop.f32.mrf.mxu2  ;;  %v588_v24 = vpop.f32.mrf.mxu0 }
  0xab   :  { %v625_v23 = vpop.f32.mrf.mxu3  ;;  %v601_v25 = vpop.f32.mrf.mxu1  ;;  %v613_v29 = vadd.f32 %v612_v22, %v600_v28 }
  0xad   :  { %v626_v30 = vadd.f32 %v625_v23, %v613_v29 }
  0xb2   :  { %v614_v26 = vpop.f32.mrf.mxu2 }
  0xb3   :  { %v627_v27 = vpop.f32.mrf.mxu3 }
  0xc2   :  { %v638_v31 = vpop.f32.mrf.mxu0 }
  0xc3   :  { %v651_v32 = vpop.f32.mrf.mxu1  ;;  %v639_v33 = vadd.f32 %v638_v31, %v626_v30 }
  0xc5   :  { %v652_v34 = vadd.f32 %v651_v32, %v639_v33 }
  0xca   :  { %v664_v35 = vpop.f32.mrf.mxu2  ;;  %v640_v38 = vpop.f32.mrf.mxu0 }
  0xcb   :  { %v677_v36 = vpop.f32.mrf.mxu3  ;;  %v665_v37 = vadd.f32 %v664_v35, %v652_v34  ;;  %v653_v39 = vpop.f32.mrf.mxu1 }
  0xcd   :  { %v678_v40 = vadd.f32 %v677_v36, %v665_v37 }
  0xcf   :  { %v687_v41 = vpack.c.bf16 %v678_v40, %v678_v40 }
  0xd1   :  { %688 = vst [vmem:[%s1081_s2] sm:$0xf] %v687_v41 }
  0xd2   :  { %v666_v42 = vpop.f32.mrf.mxu2 }
  0xd3   :  { %v679_v43 = vpop.f32.mrf.mxu3 }
  0xd4   :  { %693 = vsyncpa [#allocation4], 1 }

</bundles_post_ra>
